<compile_context>
chip_gen: v5e
topology: v5e:2x2
jax: 0.10.0
libtpu: 0.0.40
codegen_flags: <defaults>
</compile_context>

<pallas_src>
import jax
import jax.numpy as jnp
from jax.experimental import pallas as pl
from jax.experimental.pallas import tpu as pltpu


def _denoiser_kernel(ts_ref, gain_ref, out_ref):
    # ts_ref:   (tR, C)  native floating dtype
    # gain_ref: (tR, 1)  same dtype as ts  (= mask * rsqrt(1 + timestep))
    # out_ref:  (tR, C)  native floating dtype
    # Multiply runs in the native dtype: bf16 VPU on v6e/v7x, f32 on v5e/f32 inputs.
    out_ref[...] = ts_ref[...] * gain_ref[...]


def _pick_row_tile(R, C, dtype, requested=None):
    """Pick a fused-row tile length (multiple of the sublane packing)."""
    itemsize = jnp.dtype(dtype).itemsize
    pack = 32 // itemsize  # rows per packed (8,128) tile: 8 f32, 16 bf16
    if requested is not None:
        if requested >= R:
            return R
        return max(pack, (requested // pack) * pack)
    # Per-stage bytes: ts tile + out tile (C lanes each) + gain tile
    # (lane-padded to 128, same dtype as ts).  Streaming kernels hit ~85% of
    # HBM roofline by ~512-1024 rows at C=128; a ~2 MiB stage (≈1360 f32 /
    # ≈2720 bf16 rows) is past the knee yet keeps the double-buffered pipeline
    # tiny relative to every generation's VMEM (incl. v7x's 64 MiB per TC).
    budget = 2 * 1024 * 1024
    bytes_per_row = (2 * C + 128) * itemsize
    tR = budget // bytes_per_row
    tR = max(pack, (tR // pack) * pack)
    if tR >= R:
        return R
    return tR


def denoiser_forward(ts, timesteps, mask, *, row_tile=None):
    """Concrete Denoiser.forward(ts, timesteps, mask) as a Pallas TPU kernel.

    ts:        (B, T, C)  floating dtype; output dtype matches ts.dtype
    timesteps: (B,)
    mask:      (B, T)
    """
    if not jnp.issubdtype(ts.dtype, jnp.floating):
        raise TypeError(f"denoiser_forward requires floating ts, got {ts.dtype}")

    B, T, C = ts.shape
    R = B * T

    # Tiny (B, T) op in the wrapper: fold rsqrt(1 + t) and the mask into one
    # gain, cast to the streaming dtype, and flatten batch x time into rows.
    gain = (
        mask.astype(jnp.float32)
        * jax.lax.rsqrt(1.0 + timesteps.astype(jnp.float32))[:, None]
    )
    gain2d = gain.reshape(R, 1).astype(ts.dtype)
    ts2d = ts.reshape(R, C)  # free: contiguous reshape

    tR = _pick_row_tile(R, C, ts.dtype, requested=row_tile)
    grid = (pl.cdiv(R, tR),)

    # Explicit VMEM budget: double-buffered stages plus headroom, capped so it
    # fits v7x's 64 MiB/TC (32 MiB scoped default) as well as v5e/v6e.
    itemsize = jnp.dtype(ts.dtype).itemsize
    stage_bytes = tR * (2 * C + 128) * itemsize
    vmem_limit = int(min(32 * 1024 * 1024, max(8 * 1024 * 1024, 4 * stage_bytes)))

    out2d = pl.pallas_call(
        _denoiser_kernel,
        out_shape=jax.ShapeDtypeStruct((R, C), ts.dtype),
        grid_spec=pl.GridSpec(
            grid=grid,
            in_specs=[
                pl.BlockSpec((tR, C), lambda i: (i, 0)),
                pl.BlockSpec((tR, 1), lambda i: (i, 0)),
            ],
            out_specs=pl.BlockSpec((tR, C), lambda i: (i, 0)),
        ),
        compiler_params=pltpu.CompilerParams(
            dimension_semantics=("parallel",),
            vmem_limit_bytes=vmem_limit,
        ),
    )(ts2d, gain2d)

    return out2d.reshape(B, T, C)


def denoiser_reference(ts, timesteps, mask):
    scale = jax.lax.rsqrt(1.0 + timesteps.astype(jnp.float32))[:, None, None]
    return ts.astype(jnp.float32) * scale * mask.astype(jnp.float32)[:, :, None]


if __name__ == "__main__":
    key = jax.random.PRNGKey(0)
    k_ts, k_t, k_m = jax.random.split(key, 3)

    # Small but TPU-friendly shapes: lane-dense channels (C = 128).
    B, T, C = 2, 128, 128
    ts = jax.random.normal(k_ts, (B, T, C), dtype=jnp.float32)
    timesteps = jax.random.uniform(
        k_t, (B,), minval=0.0, maxval=1000.0, dtype=jnp.float32
    )
    mask = (jax.random.uniform(k_m, (B, T)) > 0.3).astype(jnp.float32)

    ref = denoiser_reference(ts, timesteps, mask)

    # 1) Auto tile size (single row block at this small B*T).
    out_auto = jax.block_until_ready(denoiser_forward(ts, timesteps, mask))
    assert out_auto.shape == (B, T, C) and out_auto.dtype == ts.dtype
    assert jnp.allclose(out_auto, ref, atol=1e-5, rtol=1e-5)

    # 2) Forced small row tile -> multi-step 1-D grid with a partial last tile
    #    (B*T = 256 rows, tile = 96 rows -> 2 full blocks + 64-row remainder),
    #    exercising masking of both the ts and (tR, 1) gain blocks.
    out_tiled = jax.block_until_ready(
        denoiser_forward(ts, timesteps, mask, row_tile=96)
    )
    assert jnp.allclose(out_tiled, ref, atol=1e-5, rtol=1e-5)

    # 3) Native bf16 path: gain cast to bf16, multiply in bf16, output bf16.
    ts_bf16 = ts.astype(jnp.bfloat16)
    out_bf16 = jax.block_until_ready(
        denoiser_forward(ts_bf16, timesteps, mask, row_tile=96)
    )
    ref_bf16 = denoiser_reference(ts_bf16, timesteps, mask)
    assert out_bf16.dtype == jnp.bfloat16
    assert jnp.allclose(
        out_bf16.astype(jnp.float32), ref_bf16, atol=3e-2, rtol=3e-2
    )

    print("KERNEL_OK")
</pallas_src>

<mosaic_0001>
module attributes {stable_mosaic.version = 11 : i64} {
  func.func @_denoiser_kernel(%arg0: i32, %arg1: memref<256x128xf32, #tpu.memory_space<vmem>>, %arg2: memref<256x1xf32, #tpu.memory_space<vmem>>, %arg3: memref<256x128xf32, #tpu.memory_space<vmem>>) attributes {dimension_semantics = [#tpu.dimension_semantics<parallel>], iteration_bounds = array<i64: 1>, scalar_prefetch = 0 : i64, scratch_operands = 0 : i64, tpu.core_type = #tpu.core_type<tc>, window_params = [{transform_indices = @transform_0, window_bounds = array<i64: 256, 128>}, {transform_indices = @transform_1, window_bounds = array<i64: 256, 1>}, {transform_indices = @transform_2, window_bounds = array<i64: 256, 128>}]} {
    %c0 = arith.constant 0 : index
    %c0_0 = arith.constant 0 : index
    %0 = vector.load %arg1[%c0, %c0_0] : memref<256x128xf32, #tpu.memory_space<vmem>>, vector<256x128xf32>
    %c0_1 = arith.constant 0 : index
    %c0_2 = arith.constant 0 : index
    %1 = vector.load %arg2[%c0_1, %c0_2] : memref<256x1xf32, #tpu.memory_space<vmem>>, vector<256x1xf32>
    %2 = vector.broadcast %1 : vector<256x1xf32> to vector<256x128xf32>
    %3 = arith.mulf %0, %2 : vector<256x128xf32>
    %c0_3 = arith.constant 0 : index
    %c0_4 = arith.constant 0 : index
    %4 = vector.load %arg3[%c0_3, %c0_4] : memref<256x128xf32, #tpu.memory_space<vmem>>, vector<256x128xf32>
    tpu.vector_store %arg3[%c0_3, %c0_4], %3 {strides = array<i32>} : memref<256x128xf32, #tpu.memory_space<vmem>>, vector<256x128xf32>,
    return
  }
  func.func @transform_0(%arg0: i32) -> (i32, i32) {
    %c0_i32 = arith.constant 0 : i32
    %c0_i32_0 = arith.constant 0 : i32
    return %arg0, %c0_i32 : i32, i32
  }
  func.func @transform_1(%arg0: i32) -> (i32, i32) {
    %c0_i32 = arith.constant 0 : i32
    %c0_i32_0 = arith.constant 0 : i32
    return %arg0, %c0_i32 : i32, i32
  }
  func.func @transform_2(%arg0: i32) -> (i32, i32) {
    %c0_i32 = arith.constant 0 : i32
    %c0_i32_0 = arith.constant 0 : i32
    return %arg0, %c0_i32 : i32, i32
  }
}

</mosaic_0001>

<bundles_post_ra>
// kernel: tpu_custom_call.1
= control target key start
LH: loop header
LB: loop body
LE: loop exit
PB: predicated region body
PF: predicated region fallthrough
CT: control target
= control target key end

     0   :  { %v351_v3 = vmov 0   ;;  %s565_s0 = inlined_call_operand.vmem [shape: f32[256,128], index: 0, kind: input, shape index: {}]   ;;  %s566_s1 = inlined_call_operand.vmem [shape: f32[256,1], index: 1, kind: input, shape index: {}]   ;;  %s567_s2 = inlined_call_operand.hbm [shape: f32[256,128], index: 2, kind: output, shape index: {}]  }
   0x1   :  { %v48_v0 = vld [vmem:[%s566_s1 + $0x20] sm:$0xff]  ;;  %v46_v1 = vld [vmem:[%s566_s1 + $0x10] sm:$0xff]  ;;  %324 = vset.pattern.permute.xlu2 %v351_v3  ;;  %323 = vset.pattern.permute.xlu1 %v351_v3 }
   0x2   :  { %v44_v2 = vld [vmem:[%s566_s1] sm:$0xff]  ;;  %322 = vset.pattern.permute.xlu0 %v351_v3  ;;  %98 = vperm.xlu2 %324, %v48_v0  }
   0x3   :  { %88 = vperm.xlu1 %323, %v46_v1   ;;  %78 = vperm.xlu0 %322, %v44_v2  }
   0x4   :  { %7 = vsyncpa [#allocation3], 0  ;;  %v49_v4 = vld [vmem:[%s566_s1 + $0x28] sm:$0xff]  ;;  %v47_v5 = vld [vmem:[%s566_s1 + $0x18] sm:$0xff]  ;;  %s306_s26 = sshll.u32 %s567_s2, 4  ;;  %s353_s27 = smov 128   ;;  %s307_s26 = int_to_ptr.hbm [resolvable:$true] %s306_s26 }
   0x5   :  { %v45_v6 = vld [vmem:[%s566_s1 + $0x8] sm:$0xff]  ;;  %v52_v7 = vld [vmem:[%s566_s1 + $0x40] sm:$0xff]  ;;  %v51_v8 = vld [vmem:[%s566_s1 + $0x38] sm:$0xff]  ;;  %s354_s28 = smov 8  }
   0x6   :  { %v50_v9 = vld [vmem:[%s566_s1 + $0x30] sm:$0xff]  ;;  %v55_v10 = vld [vmem:[%s566_s1 + $0x58] sm:$0xff]  ;;  %v53_v12 = vld [vmem:[%s566_s1 + $0x48] sm:$0xff] }
   0x7   :  { %v54_v11 = vld [vmem:[%s566_s1 + $0x50] sm:$0xff]  ;;  %v57_v14 = vld [vmem:[%s566_s1 + $0x68] sm:$0xff]  ;;  %v56_v15 = vld [vmem:[%s566_s1 + $0x60] sm:$0xff] }
   0x8   :  { %v58_v13 = vld [vmem:[%s566_s1 + $0x70] sm:$0xff]  ;;  %v61_v16 = vld [vmem:[%s566_s1 + $0x88] sm:$0xff]  ;;  %v60_v17 = vld [vmem:[%s566_s1 + $0x80] sm:$0xff] }
   0x9   :  { %v59_v18 = vld [vmem:[%s566_s1 + $0x78] sm:$0xff]  ;;  %v64_v19 = vld [vmem:[%s566_s1 + $0xa0] sm:$0xff]  ;;  %v62_v21 = vld [vmem:[%s566_s1 + $0x90] sm:$0xff] }
   0xa   :  { %103 = vperm.xlu2 %324, %v49_v4   ;;  %v63_v20 = vld [vmem:[%s566_s1 + $0x98] sm:$0xff]  ;;  %v66_v23 = vld [vmem:[%s566_s1 + $0xb0] sm:$0xff]  ;;  %v65_v24 = vld [vmem:[%s566_s1 + $0xa8] sm:$0xff] }
   0xb   :  { %93 = vperm.xlu1 %323, %v47_v5   ;;  %83 = vperm.xlu0 %322, %v45_v6   ;;  %v67_v22 = vld [vmem:[%s566_s1 + $0xb8] sm:$0xff]  ;;  %v70_v25 = vld [vmem:[%s566_s1 + $0xd0] sm:$0xff]  ;;  %v69_v26 = vld [vmem:[%s566_s1 + $0xc8] sm:$0xff] }
   0xc   :  { %v68_v27 = vld [vmem:[%s566_s1 + $0xc0] sm:$0xff]  ;;  %v73_v28 = vld [vmem:[%s566_s1 + $0xe8] sm:$0xff]  ;;  %v71_v30 = vld [vmem:[%s566_s1 + $0xd8] sm:$0xff] }
   0xd   :  { %v72_v29 = vld [vmem:[%s566_s1 + $0xe0] sm:$0xff]  ;;  %v75_v31 = vld [vmem:[%s566_s1 + $0xf8] sm:$0xff]  ;;  %v74_v32 = vld [vmem:[%s566_s1 + $0xf0] sm:$0xff]  ;;  %s352_s1 = smov [#allocation2]  }
   0xe   :  { %v16_v33 = vld [vmem:[%s565_s0 + $0x20] sm:$0xff]  ;;  %v17_v36 = vld [vmem:[%s565_s0 + $0x28] sm:$0xff]  ;;  %v23_v42 = vld [vmem:[%s565_s0 + $0x58] sm:$0xff]  ;;  %s304_s23 = sshll.u32 %s352_s1, 4  ;;  %s305_s23 = int_to_ptr.vmem [resolvable:$true] %s304_s23 }
   0xf   :  { %v20_v39 = vld [vmem:[%s565_s0 + $0x40] sm:$0xff]  ;;  %v14_v43 = vld [vmem:[%s565_s0 + $0x10] sm:$0xff]  ;;  %v15_v52 = vld [vmem:[%s565_s0 + $0x18] sm:$0xff] }
  0x10   :  { %v12_v44 = vld [vmem:[%s565_s0] sm:$0xff]  ;;  %v26_v51 = vld [vmem:[%s565_s0 + $0x70] sm:$0xff]  ;;  %v13_v53 = vld [vmem:[%s565_s0 + $0x8] sm:$0xff] }
  0x11   :  { %v29_v60 = vld [vmem:[%s565_s0 + $0x88] sm:$0xff]  ;;  %v19_v61 = vld [vmem:[%s565_s0 + $0x38] sm:$0xff]  ;;  %v18_v62 = vld [vmem:[%s565_s0 + $0x30] sm:$0xff] }
  0x12   :  { %118 = vperm.xlu2 %324, %v52_v7   ;;  %v32_v5 = vld [vmem:[%s565_s0 + $0xa0] sm:$0xff]  ;;  %v22_v6 = vld [vmem:[%s565_s0 + $0x50] sm:$0xff]  ;;  %v21_v7 = vld [vmem:[%s565_s0 + $0x48] sm:$0xff] }
  0x13   :  { %113 = vperm.xlu1 %323, %v51_v8   ;;  %108 = vperm.xlu0 %322, %v50_v9  }
  0x1a   :  { %133 = vperm.xlu2 %324, %v55_v10  }
  0x1b   :  { %128 = vperm.xlu1 %323, %v54_v11   ;;  %123 = vperm.xlu0 %322, %v53_v12  }
  0x22   :  { %148 = vperm.xlu2 %324, %v58_v13  }
  0x23   :  { %143 = vperm.xlu1 %323, %v57_v14   ;;  %138 = vperm.xlu0 %322, %v56_v15   ;;  %v35_v14 = vld [vmem:[%s565_s0 + $0xb8] sm:$0xff]  ;;  %v25_v15 = vld [vmem:[%s565_s0 + $0x68] sm:$0xff] }
  0x2a   :  { %163 = vperm.xlu2 %324, %v61_v16   ;;  %v24_v16 = vld [vmem:[%s565_s0 + $0x60] sm:$0xff] }
  0x2b   :  { %158 = vperm.xlu1 %323, %v60_v17   ;;  %153 = vperm.xlu0 %322, %v59_v18  }
  0x32   :  { %178 = vperm.xlu2 %324, %v64_v19  }
  0x33   :  { %173 = vperm.xlu1 %323, %v63_v20   ;;  %168 = vperm.xlu0 %322, %v62_v21  }
  0x3a   :  { %193 = vperm.xlu2 %324, %v67_v22  }
  0x3b   :  { %188 = vperm.xlu1 %323, %v66_v23   ;;  %183 = vperm.xlu0 %322, %v65_v24   ;;  %v38_v23 = vld [vmem:[%s565_s0 + $0xd0] sm:$0xff]  ;;  %v28_v24 = vld [vmem:[%s565_s0 + $0x80] sm:$0xff] }
  0x42   :  { %208 = vperm.xlu2 %324, %v70_v25   ;;  %v27_v25 = vld [vmem:[%s565_s0 + $0x78] sm:$0xff] }
  0x43   :  { %203 = vperm.xlu1 %323, %v69_v26   ;;  %198 = vperm.xlu0 %322, %v68_v27  }
  0x4a   :  { %223 = vperm.xlu2 %324, %v73_v28  }
  0x4b   :  { %218 = vperm.xlu1 %323, %v72_v29   ;;  %213 = vperm.xlu0 %322, %v71_v30  }
  0x53   :  { %233 = vperm.xlu1 %323, %v75_v31   ;;  %228 = vperm.xlu0 %322, %v74_v32   ;;  %v41_v32 = vld [vmem:[%s565_s0 + $0xe8] sm:$0xff] }
  0x5c   :  { %v99_v34 = vpop.permute.xlu2 %98 }
  0x5d   :  { %v240_v35 = vmul.f32 %v99_v34, %v16_v33  ;;  %v31_v33 = vld [vmem:[%s565_s0 + $0x98] sm:$0xff]  ;;  %v30_v34 = vld [vmem:[%s565_s0 + $0x90] sm:$0xff] }
  0x5f   :  { %272 = vst [vmem:[#allocation2 + $0x20] sm:$0xff] %v240_v35 }
  0x64   :  { %v104_v37 = vpop.permute.xlu2 %103 }
  0x65   :  { %v241_v38 = vmul.f32 %v104_v37, %v17_v36 }
  0x67   :  { %273 = vst [vmem:[#allocation2 + $0x28] sm:$0xff] %v241_v38 }
  0x6c   :  { %v119_v40 = vpop.permute.xlu2 %118 }
  0x6d   :  { %v244_v41 = vmul.f32 %v119_v40, %v20_v39 }
  0x6f   :  { %276 = vst [vmem:[#allocation2 + $0x40] sm:$0xff] %v244_v41  ;;  %v34_v41 = vld [vmem:[%s565_s0 + $0xb0] sm:$0xff] }
  0x74   :  { %v134_v45 = vpop.permute.xlu2 %133 }
  0x75   :  { %v247_v46 = vmul.f32 %v134_v45, %v23_v42  ;;  %v89_v47 = vpop.permute.xlu1 %88  ;;  %v79_v48 = vpop.permute.xlu0 %78  ;;  %v33_v42 = vld [vmem:[%s565_s0 + $0xa8] sm:$0xff] }
  0x76   :  { %v238_v49 = vmul.f32 %v89_v47, %v14_v43  ;;  %v236_v50 = vmul.f32 %v79_v48, %v12_v44  ;;  %v37_v47 = vld [vmem:[%s565_s0 + $0xc8] sm:$0xff]  ;;  %v36_v48 = vld [vmem:[%s565_s0 + $0xc0] sm:$0xff] }
  0x77   :  { %279 = vst [vmem:[#allocation2 + $0x58] sm:$0xff] %v247_v46 }
  0x78   :  { %270 = vst [vmem:[#allocation2 + $0x10] sm:$0xff] %v238_v49 }
  0x79   :  { %268 = vst [vmem:[#allocation2] sm:$0xff] %v236_v50 }
  0x7c   :  { %v149_v54 = vpop.permute.xlu2 %148 }
  0x7d   :  { %v250_v55 = vmul.f32 %v149_v54, %v26_v51  ;;  %v94_v56 = vpop.permute.xlu1 %93  ;;  %v84_v57 = vpop.permute.xlu0 %83  ;;  %v39_v54 = vld [vmem:[%s565_s0 + $0xd8] sm:$0xff] }
  0x7e   :  { %v239_v58 = vmul.f32 %v94_v56, %v15_v52  ;;  %v237_v59 = vmul.f32 %v84_v57, %v13_v53  ;;  %v40_v53 = vld [vmem:[%s565_s0 + $0xe0] sm:$0xff] }
  0x7f   :  { %282 = vst [vmem:[#allocation2 + $0x70] sm:$0xff] %v250_v55 }
  0x80   :  { %271 = vst [vmem:[#allocation2 + $0x18] sm:$0xff] %v239_v58 }
  0x81   :  { %269 = vst [vmem:[#allocation2 + $0x8] sm:$0xff] %v237_v59  ;;  %v43_v59 = vld [vmem:[%s565_s0 + $0xf8] sm:$0xff] }
  0x84   :  { %v164_v63 = vpop.permute.xlu2 %163 }
  0x85   :  { %v253_v0 = vmul.f32 %v164_v63, %v29_v60  ;;  %v114_v1 = vpop.permute.xlu1 %113  ;;  %v109_v2 = vpop.permute.xlu0 %108  ;;  %v42_v60 = vld [vmem:[%s565_s0 + $0xf0] sm:$0xff] }
  0x86   :  { %v243_v3 = vmul.f32 %v114_v1, %v19_v61  ;;  %v242_v4 = vmul.f32 %v109_v2, %v18_v62 }
  0x87   :  { %285 = vst [vmem:[#allocation2 + $0x88] sm:$0xff] %v253_v0 }
  0x88   :  { %275 = vst [vmem:[#allocation2 + $0x38] sm:$0xff] %v243_v3 }
  0x89   :  { %274 = vst [vmem:[#allocation2 + $0x30] sm:$0xff] %v242_v4 }
  0x8c   :  { %v179_v8 = vpop.permute.xlu2 %178 }
  0x8d   :  { %v256_v9 = vmul.f32 %v179_v8, %v32_v5  ;;  %v129_v10 = vpop.permute.xlu1 %128  ;;  %v124_v11 = vpop.permute.xlu0 %123 }
  0x8e   :  { %v246_v12 = vmul.f32 %v129_v10, %v22_v6  ;;  %v245_v13 = vmul.f32 %v124_v11, %v21_v7 }
  0x8f   :  { %288 = vst [vmem:[#allocation2 + $0xa0] sm:$0xff] %v256_v9 }
  0x90   :  { %278 = vst [vmem:[#allocation2 + $0x50] sm:$0xff] %v246_v12 }
  0x91   :  { %277 = vst [vmem:[#allocation2 + $0x48] sm:$0xff] %v245_v13 }
  0x94   :  { %v194_v17 = vpop.permute.xlu2 %193 }
  0x95   :  { %v259_v18 = vmul.f32 %v194_v17, %v35_v14  ;;  %v144_v19 = vpop.permute.xlu1 %143  ;;  %v139_v20 = vpop.permute.xlu0 %138 }
  0x96   :  { %v249_v21 = vmul.f32 %v144_v19, %v25_v15  ;;  %v248_v22 = vmul.f32 %v139_v20, %v24_v16 }
  0x97   :  { %291 = vst [vmem:[#allocation2 + $0xb8] sm:$0xff] %v259_v18 }
  0x98   :  { %281 = vst [vmem:[#allocation2 + $0x68] sm:$0xff] %v249_v21 }
  0x99   :  { %280 = vst [vmem:[#allocation2 + $0x60] sm:$0xff] %v248_v22 }
  0x9c   :  { %v209_v26 = vpop.permute.xlu2 %208 }
  0x9d   :  { %v262_v27 = vmul.f32 %v209_v26, %v38_v23  ;;  %v159_v28 = vpop.permute.xlu1 %158  ;;  %v154_v29 = vpop.permute.xlu0 %153 }
  0x9e   :  { %v252_v30 = vmul.f32 %v159_v28, %v28_v24  ;;  %v251_v31 = vmul.f32 %v154_v29, %v27_v25 }
  0x9f   :  { %294 = vst [vmem:[#allocation2 + $0xd0] sm:$0xff] %v262_v27 }
  0xa0   :  { %284 = vst [vmem:[#allocation2 + $0x80] sm:$0xff] %v252_v30 }
  0xa1   :  { %283 = vst [vmem:[#allocation2 + $0x78] sm:$0xff] %v251_v31 }
  0xa4   :  { %v224_v35 = vpop.permute.xlu2 %223 }
  0xa5   :  { %v265_v36 = vmul.f32 %v224_v35, %v41_v32  ;;  %v174_v37 = vpop.permute.xlu1 %173  ;;  %v169_v38 = vpop.permute.xlu0 %168 }
  0xa6   :  { %v255_v39 = vmul.f32 %v174_v37, %v31_v33  ;;  %v254_v40 = vmul.f32 %v169_v38, %v30_v34 }
  0xa7   :  { %297 = vst [vmem:[#allocation2 + $0xe8] sm:$0xff] %v265_v36 }
  0xa8   :  { %287 = vst [vmem:[#allocation2 + $0x98] sm:$0xff] %v255_v39 }
  0xa9   :  { %286 = vst [vmem:[#allocation2 + $0x90] sm:$0xff] %v254_v40 }
  0xad   :  { %v189_v43 = vpop.permute.xlu1 %188  ;;  %v184_v44 = vpop.permute.xlu0 %183 }
  0xae   :  { %v258_v45 = vmul.f32 %v189_v43, %v34_v41  ;;  %v257_v46 = vmul.f32 %v184_v44, %v33_v42 }
  0xb0   :  { %290 = vst [vmem:[#allocation2 + $0xb0] sm:$0xff] %v258_v45 }
  0xb1   :  { %289 = vst [vmem:[#allocation2 + $0xa8] sm:$0xff] %v257_v46 }
  0xb5   :  { %v204_v49 = vpop.permute.xlu1 %203  ;;  %v199_v50 = vpop.permute.xlu0 %198 }
  0xb6   :  { %v261_v51 = vmul.f32 %v204_v49, %v37_v47  ;;  %v260_v52 = vmul.f32 %v199_v50, %v36_v48 }
  0xb8   :  { %293 = vst [vmem:[#allocation2 + $0xc8] sm:$0xff] %v261_v51 }
  0xb9   :  { %292 = vst [vmem:[#allocation2 + $0xc0] sm:$0xff] %v260_v52 }
  0xbd   :  { %v219_v55 = vpop.permute.xlu1 %218  ;;  %v214_v56 = vpop.permute.xlu0 %213 }
  0xbe   :  { %v264_v57 = vmul.f32 %v219_v55, %v40_v53  ;;  %v263_v58 = vmul.f32 %v214_v56, %v39_v54 }
  0xc0   :  { %296 = vst [vmem:[#allocation2 + $0xe0] sm:$0xff] %v264_v57 }
  0xc1   :  { %295 = vst [vmem:[#allocation2 + $0xd8] sm:$0xff] %v263_v58 }
  0xc5   :  { %v234_v61 = vpop.permute.xlu1 %233  ;;  %v229_v62 = vpop.permute.xlu0 %228 }
  0xc6   :  { %v267_v63 = vmul.f32 %v234_v61, %v43_v59  ;;  %v266_v0 = vmul.f32 %v229_v62, %v42_v60 }
  0xc8   :  { %299 = vst [vmem:[#allocation2 + $0xf8] sm:$0xff] %v267_v63 }
  0xc9   :  { %298 = vst [vmem:[#allocation2 + $0xf0] sm:$0xff] %v266_v0 }
  0xca   :  { %312 = dma.vmem_to_hbm [thread:$0]  %s305_s23, 4096, %s307_s26, [#allocation3], %s353_s27, %s353_s27, %s354_s28  }
  0xcb   :  { %349 = dma.done.wait [#allocation3], 4096  }
  0xcc   :  { %350 = vsyncadd [#allocation3], 4294963200 }
  0xcd   :  { %317 = vsyncpa [#allocation3], 1 }

</bundles_post_ra>
